<compile_context>
chip_gen: v6e
topology: v6e:2x2x1
jax: 0.10.0
libtpu: 0.0.40
codegen_flags: <defaults>
</compile_context>

<pallas_src>
import functools

import jax
import jax.numpy as jnp
from jax.experimental import pallas as pl
from jax.experimental.pallas import tpu as pltpu


def _round_up(n: int, m: int) -> int:
    return ((n + m - 1) // m) * m


def _fused_mlp_kernel(x_ref, w1_ref, b1_ref, w2_ref, b2_ref, o_ref):
    # Layer 1: (tm, Kp) @ (Kp, Hp) on the MXU, f32 accumulate, bias + ReLU.
    h = jnp.dot(x_ref[...], w1_ref[...], preferred_element_type=jnp.float32)
    h = jnp.maximum(h + b1_ref[...], 0.0)
    # Layer 2: (tm, Hp) @ (Hp, Cp), f32 accumulate, bias + ReLU.
    h = h.astype(w2_ref.dtype)
    o = jnp.dot(h, w2_ref[...], preferred_element_type=jnp.float32)
    o_ref[...] = jnp.maximum(o + b2_ref[...], 0.0).astype(o_ref.dtype)


@jax.jit
def drlim_prune_grow_forward(x_pair, W1, A1, b1, W2, A2, b2):
    """Siamese forward.

    x_pair: (n_views, B, 28, 28) f32 (any trailing spatial dims; flattened here)
    W1/A1:  (784, 16) f32, b1: (16,) f32
    W2/A2:  (16, low_dim) f32, b2: (low_dim,) f32
    returns (n_views, B, low_dim) f32
    """
    n_views, B = x_pair.shape[0], x_pair.shape[1]
    x = x_pair.reshape(n_views * B, -1).astype(jnp.float32)
    M, D = x.shape
    H = W1.shape[1]
    C = W2.shape[1]

    # Fold the alive masks into the weights (done once per mask update, not in
    # the kernel) and cast the streamed operands to bf16.
    w1m = W1 * A1
    w2m = W2 * A2

    # Lane-dense padding: last dims -> multiple of 128, rows -> multiple of 8.
    Kp = _round_up(D, 128)
    Hp = _round_up(H, 128)
    Cp = _round_up(C, 128)
    tm = 128 if M >= 128 else _round_up(M, 8)
    Mp = _round_up(M, tm)

    x_p = jnp.pad(x, ((0, Mp - M), (0, Kp - D))).astype(jnp.bfloat16)
    w1_p = jnp.pad(w1m, ((0, Kp - D), (0, Hp - H))).astype(jnp.bfloat16)
    w2_p = jnp.pad(w2m, ((0, Hp - H), (0, Cp - C))).astype(jnp.bfloat16)
    b1_p = jnp.pad(b1.reshape(1, H), ((0, 0), (0, Hp - H))).astype(jnp.float32)
    b2_p = jnp.pad(b2.reshape(1, C), ((0, 0), (0, Cp - C))).astype(jnp.float32)

    out_p = pl.pallas_call(
        _fused_mlp_kernel,
        out_shape=jax.ShapeDtypeStruct((Mp, Cp), jnp.float32),
        grid=(Mp // tm,),
        in_specs=[
            pl.BlockSpec((tm, Kp), lambda i: (i, 0)),   # x rows, tiled over M
            pl.BlockSpec((Kp, Hp), lambda i: (0, 0)),   # masked W1 (resident)
            pl.BlockSpec((1, Hp), lambda i: (0, 0)),    # b1 (resident)
            pl.BlockSpec((Hp, Cp), lambda i: (0, 0)),   # masked W2 (resident)
            pl.BlockSpec((1, Cp), lambda i: (0, 0)),    # b2 (resident)
        ],
        out_specs=pl.BlockSpec((tm, Cp), lambda i: (i, 0)),
        compiler_params=pltpu.CompilerParams(
            dimension_semantics=("parallel",),          # megacore split on v7x
            vmem_limit_bytes=32 * 1024 * 1024,          # safe on v5e/v6e/v7x
        ),
    )(x_p, w1_p, b1_p, w2_p, b2_p)

    return out_p[:M, :C].reshape(n_views, B, C)


def make_masked_layer_params(key, input_dim, output_dim, init_density):
    """Synthetic init mirroring BaseDenseLayer.__init__ semantics."""
    k_idx, k_w = jax.random.split(key)

    # A: 0/1 alive mask with ~init_density fraction set (sampled w/ replacement,
    # like np.random.choice(..., size=num_init) in the reference).
    num_init = max(int(init_density * input_dim * output_dim), 1)
    flat_size = input_dim * output_dim
    idx = jax.random.randint(k_idx, (num_init,), 0, flat_size)
    A = jnp.zeros((flat_size,), jnp.float32).at[idx].set(1.0)
    A = A.reshape(input_dim, output_dim)

    # W: kaiming-uniform-style init, zeroed where A != 1 (mask re-applied in fwd).
    bound = jnp.sqrt(2.0) * jnp.sqrt(3.0 / input_dim)
    W = jax.random.uniform(
        k_w, (input_dim, output_dim), jnp.float32, minval=-bound, maxval=bound
    )
    W = jnp.where(A == 1.0, W, 0.0)

    b = jnp.zeros((output_dim,), jnp.float32)
    return W, A, b


def _reference_forward(x_pair, W1, A1, b1, W2, A2, b2):
    n_views, B = x_pair.shape[0], x_pair.shape[1]
    x = x_pair.reshape(n_views * B, -1)
    h = jax.nn.relu(x @ (W1 * A1) + b1)
    o = jax.nn.relu(h @ (W2 * A2) + b2)
    return o.reshape(n_views, B, -1)


if __name__ == "__main__":
    key = jax.random.PRNGKey(0)
    k_x, k_l1, k_l2 = jax.random.split(key, 3)

    # Shapes implied by DrLIMPruneGrowNetwork: 28*28 -> 16 -> low_mapping_dim.
    batch = 4
    img = 28
    hidden = 16
    low_mapping_dim = 2
    init_density = 0.3

    # Siamese pair of inputs, stacked on a leading "view" axis.
    x_pair = jax.random.normal(k_x, (2, batch, img, img), jnp.float32)

    W1, A1, b1 = make_masked_layer_params(k_l1, img * img, hidden, init_density)
    W2, A2, b2 = make_masked_layer_params(k_l2, hidden, low_mapping_dim, init_density)

    out = drlim_prune_grow_forward(x_pair, W1, A1, b1, W2, A2, b2)
    out = jax.block_until_ready(out)

    # Reference check (plain JAX f32). Kernel streams bf16 with f32 accumulation,
    # so use a tolerance appropriate for bf16 inputs.
    ref = _reference_forward(x_pair, W1, A1, b1, W2, A2, b2)
    assert out.shape == (2, batch, low_mapping_dim)
    assert jnp.allclose(out, ref, atol=5e-2, rtol=5e-2)

    # TODO(synk): update_params / rand_grow / activity_prune (training-time mask
    # mutation with host-side RNG and argsort) are not part of the forward pass
    # and are left as host logic.

    print("KERNEL_OK")
</pallas_src>

<mosaic_0001>
module attributes {stable_mosaic.version = 11 : i64} {
  func.func @_fused_mlp_kernel(%arg0: i32, %arg1: memref<8x896xbf16, #tpu.memory_space<vmem>>, %arg2: memref<896x128xbf16, #tpu.memory_space<vmem>>, %arg3: memref<1x128xf32, #tpu.memory_space<vmem>>, %arg4: memref<128x128xbf16, #tpu.memory_space<vmem>>, %arg5: memref<1x128xf32, #tpu.memory_space<vmem>>, %arg6: memref<8x128xf32, #tpu.memory_space<vmem>>) attributes {dimension_semantics = [#tpu.dimension_semantics<parallel>], iteration_bounds = array<i64: 1>, scalar_prefetch = 0 : i64, scratch_operands = 0 : i64, tpu.core_type = #tpu.core_type<tc>, window_params = [{transform_indices = @transform_0, window_bounds = array<i64: 8, 896>}, {pipeline_mode = #tpu.pipeline_mode<synchronous>, transform_indices = @transform_1, window_bounds = array<i64: 896, 128>}, {pipeline_mode = #tpu.pipeline_mode<synchronous>, transform_indices = @transform_2, window_bounds = array<i64: 1, 128>}, {pipeline_mode = #tpu.pipeline_mode<synchronous>, transform_indices = @transform_3, window_bounds = array<i64: 128, 128>}, {pipeline_mode = #tpu.pipeline_mode<synchronous>, transform_indices = @transform_4, window_bounds = array<i64: 1, 128>}, {transform_indices = @transform_5, window_bounds = array<i64: 8, 128>}]} {
    %c0 = arith.constant 0 : index
    %c0_0 = arith.constant 0 : index
    %0 = vector.load %arg1[%c0, %c0_0] : memref<8x896xbf16, #tpu.memory_space<vmem>>, vector<8x896xbf16>
    %c0_1 = arith.constant 0 : index
    %c0_2 = arith.constant 0 : index
    %1 = vector.load %arg2[%c0_1, %c0_2] : memref<896x128xbf16, #tpu.memory_space<vmem>>, vector<896x128xbf16>
    %cst = arith.constant dense<0.000000e+00> : vector<8x128xf32>
    %2 = tpu.matmul %0, %1, %cst {dimension_numbers = #tpu.dot_dimension_numbers<[1], [0], [0], [1], [0, 0, 1, 1], [], []>} : vector<8x896xbf16>, vector<896x128xbf16>, vector<8x128xf32> -> vector<8x128xf32>
    %c0_3 = arith.constant 0 : index
    %c0_4 = arith.constant 0 : index
    %3 = vector.load %arg3[%c0_3, %c0_4] : memref<1x128xf32, #tpu.memory_space<vmem>>, vector<1x128xf32>
    %4 = vector.broadcast %3 : vector<1x128xf32> to vector<8x128xf32>
    %5 = arith.addf %2, %4 : vector<8x128xf32>
    %cst_5 = arith.constant 0.000000e+00 : f32
    %6 = vector.broadcast %cst_5 : f32 to vector<8x128xf32>
    %7 = arith.maximumf %5, %6 : vector<8x128xf32>
    %8 = arith.truncf %7 : vector<8x128xf32> to vector<8x128xbf16>
    %c0_6 = arith.constant 0 : index
    %c0_7 = arith.constant 0 : index
    %9 = vector.load %arg4[%c0_6, %c0_7] : memref<128x128xbf16, #tpu.memory_space<vmem>>, vector<128x128xbf16>
    %cst_8 = arith.constant dense<0.000000e+00> : vector<8x128xf32>
    %10 = tpu.matmul %8, %9, %cst_8 {dimension_numbers = #tpu.dot_dimension_numbers<[1], [0], [0], [1], [0, 0, 1, 1], [], []>} : vector<8x128xbf16>, vector<128x128xbf16>, vector<8x128xf32> -> vector<8x128xf32>
    %c0_9 = arith.constant 0 : index
    %c0_10 = arith.constant 0 : index
    %11 = vector.load %arg5[%c0_9, %c0_10] : memref<1x128xf32, #tpu.memory_space<vmem>>, vector<1x128xf32>
    %12 = vector.broadcast %11 : vector<1x128xf32> to vector<8x128xf32>
    %13 = arith.addf %10, %12 : vector<8x128xf32>
    %cst_11 = arith.constant 0.000000e+00 : f32
    %14 = vector.broadcast %cst_11 : f32 to vector<8x128xf32>
    %15 = arith.maximumf %13, %14 : vector<8x128xf32>
    %c0_12 = arith.constant 0 : index
    %c0_13 = arith.constant 0 : index
    %16 = vector.load %arg6[%c0_12, %c0_13] : memref<8x128xf32, #tpu.memory_space<vmem>>, vector<8x128xf32>
    tpu.vector_store %arg6[%c0_12, %c0_13], %15 {strides = array<i32>} : memref<8x128xf32, #tpu.memory_space<vmem>>, vector<8x128xf32>,
    return
  }
  func.func @transform_0(%arg0: i32) -> (i32, i32) {
    %c0_i32 = arith.constant 0 : i32
    %c0_i32_0 = arith.constant 0 : i32
    return %arg0, %c0_i32 : i32, i32
  }
  func.func @transform_1(%arg0: i32) -> (i32, i32) {
    %c0_i32 = arith.constant 0 : i32
    %c0_i32_0 = arith.constant 0 : i32
    %c0_i32_1 = arith.constant 0 : i32
    return %c0_i32, %c0_i32_0 : i32, i32
  }
  func.func @transform_2(%arg0: i32) -> (i32, i32) {
    %c0_i32 = arith.constant 0 : i32
    %c0_i32_0 = arith.constant 0 : i32
    %c0_i32_1 = arith.constant 0 : i32
    return %c0_i32, %c0_i32_0 : i32, i32
  }
  func.func @transform_3(%arg0: i32) -> (i32, i32) {
    %c0_i32 = arith.constant 0 : i32
    %c0_i32_0 = arith.constant 0 : i32
    %c0_i32_1 = arith.constant 0 : i32
    return %c0_i32, %c0_i32_0 : i32, i32
  }
  func.func @transform_4(%arg0: i32) -> (i32, i32) {
    %c0_i32 = arith.constant 0 : i32
    %c0_i32_0 = arith.constant 0 : i32
    %c0_i32_1 = arith.constant 0 : i32
    return %c0_i32, %c0_i32_0 : i32, i32
  }
  func.func @transform_5(%arg0: i32) -> (i32, i32) {
    %c0_i32 = arith.constant 0 : i32
    %c0_i32_0 = arith.constant 0 : i32
    return %arg0, %c0_i32 : i32, i32
  }
}

</mosaic_0001>

<bundles_post_ra>
// kernel: mul.2
= control target key start
LH: loop header
LB: loop body
LE: loop exit
PB: predicated region body
PF: predicated region fallthrough
CT: control target
= control target key end

     0   :  { %3 = vsyncpa [#allocation1], 0  ;;  %s311_s0 = inlined_call_operand.hbm [shape: f32[784,16], index: 0, kind: input, shape index: {}]   ;;  %s312_s1 = inlined_call_operand.hbm [shape: f32[784,16], index: 1, kind: input, shape index: {}]   ;;  %s313_s2 = inlined_call_operand.vmem [shape: bf16[784,16], index: 2, kind: output, shape index: {}]  }
   0x1   :  { %4 = vsyncpa [#allocation3], 0  ;;  %s261_s9 = smov [#allocation0]  }
   0x2   :  { %s8_s10 = sshll.u32 %s261_s9, 4  ;;  %s9_s10 = int_to_ptr.vmem [resolvable:$true] %s8_s10 }
   0x3   :  { %s225_s11 = scalar_lea.vmem %s9_s10, 1792  ;;  %p230_p1 = scmp.lt.s32.totalorder %s9_s10, %s9_s10 }
   0x4   :  { %p226_p0 = scmp.ne.s32.totalorder %s9_s10, %s225_s11  ;;  %p231_p2 = scmp.lt.s32.totalorder %s225_s11, %s225_s11 }
   0x6   :  { %p232_p3 = por %p231_p2, %p230_p1 }
   0x8   :  { %p233_p4 = pnand %p232_p3, %p226_p0 }
   0xa   :  { %236 = shalt.err (!%p233_p4)
}
   0xb   :  { %s262_s12 = smov 896   ;;  %s263_s13 = smov 56  }
   0xc   :  { %14 = dma.hbm_to_vmem [thread:$0]  %s311_s0, 1792, %s9_s10, [#allocation1], %s262_s12, %s262_s12, %s263_s13  }
   0xd   :  { %s264_s0 = smov [#allocation2]  }
   0xe   :  { %s18_s16 = sshll.u32 %s264_s0, 4  ;;  %s19_s16 = int_to_ptr.vmem [resolvable:$true] %s18_s16 }
   0xf   :  { %s245_s17 = scalar_lea.vmem %s19_s16, 1792  ;;  %p250_p6 = scmp.lt.s32.totalorder %s19_s16, %s19_s16 }
  0x10   :  { %p246_p5 = scmp.ne.s32.totalorder %s19_s16, %s245_s17  ;;  %p251_p7 = scmp.lt.s32.totalorder %s245_s17, %s245_s17 }
  0x12   :  { %p252_p8 = por %p251_p7, %p250_p6 }
  0x14   :  { %p253_p9 = pnand %p252_p8, %p246_p5 }
  0x16   :  { %256 = shalt.err (!%p253_p9)
}
  0x17   :  { %24 = dma.hbm_to_vmem [thread:$0]  %s312_s1, 1792, %s19_s16, [#allocation3], %s262_s12, %s262_s12, %s263_s13  }
  0x18   :  { %257 = dma.done.wait [#allocation1], 1792  }
  0x19   :  { %258 = vsyncadd [#allocation1], 4294965504 }
  0x1a   :  { %259 = dma.done.wait [#allocation3], 1792  }
  0x1b   :  { %260 = vsyncadd [#allocation3], 4294965504  ;;  %v27_v0 = vld [vmem:[#allocation0] sm:$0xff]  ;;  %v28_v1 = vld [vmem:[#allocation2] sm:$0xff]  ;;  %v265_v48 = vmov 0.0  }
  0x1c   :  { %v34_v2 = vld [vmem:[#allocation0 + $0x38] sm:$0xff]  ;;  %v31_v3 = vmul.f32 %v28_v1, %v27_v0  ;;  %v36_v4 = vld [vmem:[#allocation2 + $0x38] sm:$0xff]  ;;  %v57_v9 = vld [vmem:[#allocation0 + $0x40] sm:$0xff] }
  0x1d   :  { %v43_v5 = vld [vmem:[#allocation0 + $0x8] sm:$0xff]  ;;  %v45_v6 = vld [vmem:[#allocation2 + $0x8] sm:$0xff]  ;;  %v39_v7 = vmul.f32 %v36_v4, %v34_v2  ;;  %v59_v10 = vld [vmem:[#allocation2 + $0x40] sm:$0xff] }
  0x1e   :  { %v48_v8 = vmul.f32 %v45_v6, %v43_v5  ;;  %v71_v11 = vld [vmem:[#allocation0 + $0x10] sm:$0xff]  ;;  %v62_v12 = vmul.f32 %v59_v10, %v57_v9  ;;  %v73_v13 = vld [vmem:[#allocation2 + $0x10] sm:$0xff]  ;;  %v80_v14 = vld [vmem:[#allocation0 + $0x48] sm:$0xff] }
  0x1f   :  { %v82_v15 = vld [vmem:[#allocation2 + $0x48] sm:$0xff]  ;;  %v76_v17 = vmul.f32 %v73_v13, %v71_v11  ;;  %v91_v20 = vld [vmem:[#allocation2 + $0x18] sm:$0xff]  ;;  %v103_v21 = vld [vmem:[#allocation0 + $0x50] sm:$0xff] }
  0x20   :  { %v54_v16 = vpack.c.bf16 %v48_v8, %v31_v3  ;;  %v85_v18 = vmul.f32 %v82_v15, %v80_v14  ;;  %v89_v19 = vld [vmem:[#allocation0 + $0x18] sm:$0xff]  ;;  %v68_v22 = vpack.c.bf16 %v62_v12, %v39_v7  ;;  %v105_v24 = vld [vmem:[#allocation2 + $0x50] sm:$0xff]  ;;  %v119_v26 = vld [vmem:[#allocation2 + $0x20] sm:$0xff] }
  0x21   :  { %v94_v23 = vmul.f32 %v91_v20, %v89_v19  ;;  %v117_v25 = vld [vmem:[#allocation0 + $0x20] sm:$0xff]  ;;  %v108_v27 = vmul.f32 %v105_v24, %v103_v21  ;;  %v126_v29 = vld [vmem:[#allocation0 + $0x58] sm:$0xff]  ;;  %v128_v30 = vld [vmem:[#allocation2 + $0x58] sm:$0xff] }
  0x22   :  { %199 = vst [vmem:[%s313_s2] sm:$0xff] %v54_v16  ;;  %v122_v28 = vmul.f32 %v119_v26, %v117_v25  ;;  %v135_v31 = vld [vmem:[#allocation0 + $0x28] sm:$0xff]  ;;  %201 = vst [vmem:[%s313_s2 + $0x1c] sm:$0xff] %v68_v22  ;;  %v131_v33 = vmul.f32 %v128_v30, %v126_v29  ;;  %v137_v34 = vld [vmem:[#allocation2 + $0x28] sm:$0xff] }
  0x23   :  { %v100_v32 = vpack.c.bf16 %v94_v23, %v76_v17  ;;  %v149_v35 = vld [vmem:[#allocation0 + $0x60] sm:$0xff]  ;;  %v151_v36 = vld [vmem:[#allocation2 + $0x60] sm:$0xff]  ;;  %v114_v37 = vpack.c.bf16 %v108_v27, %v85_v18  ;;  %v140_v38 = vmul.f32 %v137_v34, %v135_v31  ;;  %v174_v42 = vld [vmem:[#allocation0 + $0x68] sm:$0xff] }
  0x24   :  { %v154_v39 = vmul.f32 %v151_v36, %v149_v35  ;;  %v163_v40 = vld [vmem:[#allocation0 + $0x30] sm:$0xff]  ;;  %v165_v41 = vld [vmem:[#allocation2 + $0x30] sm:$0xff]  ;;  %v176_v44 = vld [vmem:[#allocation2 + $0x68] sm:$0xff] }
  0x25   :  { %203 = vst [vmem:[%s313_s2 + $0x8] sm:$0xff] %v100_v32  ;;  %v168_v43 = vmul.f32 %v165_v41, %v163_v40  ;;  %205 = vst [vmem:[%s313_s2 + $0x24] sm:$0xff] %v114_v37  ;;  %v146_v45 = vpack.c.bf16 %v140_v38, %v122_v28  ;;  %v179_v47 = vmul.f32 %v176_v44, %v174_v42 }
  0x26   :  { %v160_v46 = vpack.c.bf16 %v154_v39, %v131_v33 }
  0x27   :  { %v171_v49 = vpack.c.bf16 %v265_v48, %v168_v43  ;;  %207 = vst [vmem:[%s313_s2 + $0x10] sm:$0xff] %v146_v45  ;;  %v182_v50 = vpack.c.bf16 %v265_v48, %v179_v47 }
  0x28   :  { %209 = vst [vmem:[%s313_s2 + $0x2c] sm:$0xff] %v160_v46 }
  0x29   :  { %210 = vst [vmem:[%s313_s2 + $0x18] sm:$0xf] %v171_v49  ;;  %211 = vst [vmem:[%s313_s2 + $0x34] sm:$0xf] %v182_v50 }
  0x2a   :  { %184 = vsyncpa [#allocation1], 1 }
  0x2b   :  { %185 = vsyncpa [#allocation3], 1 }

// kernel: mul.3
= control target key start
LH: loop header
LB: loop body
LE: loop exit
PB: predicated region body
PF: predicated region fallthrough
CT: control target
= control target key end

     0   :  { %v12_v3 = vmov 0.0   ;;  %s37_s0 = inlined_call_operand.vmem [shape: f32[16,2], index: 0, kind: input, shape index: {}]   ;;  %s38_s1 = inlined_call_operand.vmem [shape: f32[16,2], index: 1, kind: input, shape index: {}]   ;;  %s39_s2 = inlined_call_operand.vmem [shape: bf16[16,2], index: 2, kind: output, shape index: {}]  }
   0x1   :  { %v3_v0 = vld [vmem:[%s37_s0] sm:$0x3] }
   0x2   :  { %v4_v1 = vld [vmem:[%s38_s1] sm:$0x3] }
   0x3   :  { %v7_v2 = vmul.f32 %v4_v1, %v3_v0 }
   0x5   :  { %v9_v4 = vpack.c.bf16 %v12_v3, %v7_v2 }
   0x7   :  { %10 = vst [vmem:[%s39_s2] sm:$0x1] %v9_v4 }

// kernel: drlim_prune_grow_forward.1
= control target key start
LH: loop header
LB: loop body
LE: loop exit
PB: predicated region body
PF: predicated region fallthrough
CT: control target
= control target key end

     0   :  { %v1054_v39 = vmov 0.0   ;;  %vm1055_vm0 = vmmov 0   ;;  %s1319_s1 = inlined_call_operand.vmem [shape: bf16[896,128], index: 1, kind: input, shape index: {}]   ;;  %s1320_s0 = inlined_call_operand.vmem [shape: bf16[8,896], index: 0, kind: input, shape index: {}]   ;;  %s1321_s3 = inlined_call_operand.vmem [shape: bf16[128,128], index: 3, kind: input, shape index: {}]   ;;  %s1322_s2 = inlined_call_operand.vmem [shape: f32[1,128], index: 2, kind: input, shape index: {}]   ;;  %s1323_s4 = inlined_call_operand.vmem [shape: f32[1,128], index: 4, kind: input, shape index: {}]   ;;  %s1324_s5 = inlined_call_operand.vmem [shape: f32[8,128], index: 5, kind: output, shape index: {}]  }
   0x1   :  { %v983_v0 = vld [vmem:[%s1319_s1 + $0x78] sm:$0xff]   ;;  %v987_v4 = vld [vmem:[%s1319_s1 + $0x70] sm:$0xff]   ;;  %v991_v8 = vld [vmem:[%s1319_s1 + $0x68] sm:$0xff]  }
   0x2   :  { %v984_v1 = vld [vmem:[%s1319_s1 + $0xf8] sm:$0xff]   ;;  %857 = vmatprep.subr.bf16.mxu0 %v983_v0  ;;  %v988_v5 = vld [vmem:[%s1319_s1 + $0xf0] sm:$0xff]   ;;  %v992_v9 = vld [vmem:[%s1319_s1 + $0xe8] sm:$0xff]  }
   0x3   :  { %v985_v2 = vld [vmem:[%s1319_s1 + $0x38] sm:$0xff]   ;;  %879 = vmatprep.subr.bf16.mxu1 %v984_v1  ;;  %v989_v6 = vld [vmem:[%s1319_s1 + $0x30] sm:$0xff]   ;;  %v993_v10 = vld [vmem:[%s1319_s1 + $0x28] sm:$0xff]  }
   0x4   :  { %v986_v3 = vld [vmem:[%s1319_s1 + $0xb8] sm:$0xff]   ;;  %858 = vmatpush3.bf16.msra.mxu0 %v985_v2  ;;  %v990_v7 = vld [vmem:[%s1319_s1 + $0xb0] sm:$0xff]   ;;  %v994_v11 = vld [vmem:[%s1319_s1 + $0xa8] sm:$0xff]  }
   0x5   :  { %880 = vmatpush3.bf16.msra.mxu1 %v986_v3  ;;  %859 = vmatprep.subr.bf16.mxu0 %v987_v4  ;;  %v995_v12 = vld [vmem:[%s1319_s1 + $0x60] sm:$0xff]   ;;  %v999_v16 = vld [vmem:[%s1319_s1 + $0x58] sm:$0xff]   ;;  %v1003_v20 = vld [vmem:[%s1319_s1 + $0x50] sm:$0xff]  }
   0x6   :  { %881 = vmatprep.subr.bf16.mxu1 %v988_v5  ;;  %v996_v13 = vld [vmem:[%s1319_s1 + $0xe0] sm:$0xff]   ;;  %v1000_v17 = vld [vmem:[%s1319_s1 + $0xd8] sm:$0xff]   ;;  %v1004_v21 = vld [vmem:[%s1319_s1 + $0xd0] sm:$0xff]  }
   0x7   :  { %v997_v14 = vld [vmem:[%s1319_s1 + $0x20] sm:$0xff]   ;;  %v1001_v18 = vld [vmem:[%s1319_s1 + $0x18] sm:$0xff]   ;;  %v1005_v22 = vld [vmem:[%s1319_s1 + $0x10] sm:$0xff]  }
   0x8   :  { %860 = vmatpush3.bf16.msra.mxu0 %v989_v6  ;;  %v998_v15 = vld [vmem:[%s1319_s1 + $0xa0] sm:$0xff]   ;;  %v1002_v19 = vld [vmem:[%s1319_s1 + $0x98] sm:$0xff]   ;;  %v1006_v23 = vld [vmem:[%s1319_s1 + $0x90] sm:$0xff]  }
   0x9   :  { %882 = vmatpush3.bf16.msra.mxu1 %v990_v7  ;;  %861 = vmatprep.subr.bf16.mxu0 %v991_v8  ;;  %v1007_v24 = vld [vmem:[%s1319_s1 + $0x48] sm:$0xff]   ;;  %v1011_v28 = vld [vmem:[%s1319_s1 + $0x40] sm:$0xff]   ;;  %v1019_v38 = vld [vmem:[%s1319_s1 + $0x178] sm:$0xff]  }
   0xa   :  { %883 = vmatprep.subr.bf16.mxu1 %v992_v9  ;;  %v1008_v25 = vld [vmem:[%s1319_s1 + $0xc8] sm:$0xff]   ;;  %v1012_v29 = vld [vmem:[%s1319_s1 + $0xc0] sm:$0xff]   ;;  %v1020_v40 = vld [vmem:[%s1319_s1 + $0x138] sm:$0xff]  }
   0xb   :  { %v1009_v26 = vld [vmem:[%s1319_s1 + $0x8] sm:$0xff]   ;;  %v1013_v30 = vld [vmem:[%s1319_s1] sm:$0xff]   ;;  %v1021_v41 = vld [vmem:[%s1319_s1 + $0x1b8] sm:$0xff]  }
   0xc   :  { %862 = vmatpush3.bf16.msra.mxu0 %v993_v10  ;;  %v1010_v27 = vld [vmem:[%s1319_s1 + $0x88] sm:$0xff]   ;;  %v1014_v31 = vld [vmem:[%s1319_s1 + $0x80] sm:$0xff]   ;;  %v1022_v42 = vld [vmem:[%s1319_s1 + $0x170] sm:$0xff]  }
   0xd   :  { %884 = vmatpush3.bf16.msra.mxu1 %v994_v11  ;;  %863 = vmatprep.subr.bf16.mxu0 %v995_v12  ;;  %v21_v32 = vld [vmem:[%s1320_s0] sm:$0xff]  ;;  %v22_v33 = vld [vmem:[%s1320_s0 + $0x8] sm:$0xff]  ;;  %v1023_v43 = vld [vmem:[%s1319_s1 + $0x130] sm:$0xff]  }
   0xe   :  { %885 = vmatprep.subr.bf16.mxu1 %v996_v13  ;;  %v785_v34 = vcombine.low %v21_v32, %v21_v32  ;;  %v786_v35 = vcombine.high %v21_v32, %v21_v32  ;;  %v787_v36 = vcombine.low %v22_v33, %v22_v33  ;;  %v788_v37 = vcombine.high %v22_v33, %v22_v33  ;;  %v1024_v44 = vld [vmem:[%s1319_s1 + $0x1b0] sm:$0xff]   ;;  %v1025_v45 = vld [vmem:[%s1319_s1 + $0x168] sm:$0xff]   ;;  %v1028_v48 = vld [vmem:[%s1319_s1 + $0x160] sm:$0xff]  }
   0xf   :  { %v1026_v46 = vld [vmem:[%s1319_s1 + $0x128] sm:$0xff]   ;;  %v1029_v49 = vld [vmem:[%s1319_s1 + $0x120] sm:$0xff]   ;;  %v1031_v51 = vld [vmem:[%s1319_s1 + $0x158] sm:$0xff]  }
  0x10   :  { %864 = vmatpush3.bf16.msra.mxu0 %v997_v14  ;;  %537 = vmatprep.mubr.bf16.mxu0 %v786_v35  ;;  %v1027_v47 = vld [vmem:[%s1319_s1 + $0x1a8] sm:$0xff]   ;;  %v1030_v50 = vld [vmem:[%s1319_s1 + $0x1a0] sm:$0xff]   ;;  %v1032_v52 = vld [vmem:[%s1319_s1 + $0x118] sm:$0xff]  }
  0x11   :  { %886 = vmatpush3.bf16.msra.mxu1 %v998_v15  ;;  %865 = vmatprep.subr.bf16.mxu0 %v999_v16  ;;  %v1033_v53 = vld [vmem:[%s1319_s1 + $0x198] sm:$0xff]   ;;  %v1034_v54 = vld [vmem:[%s1319_s1 + $0x150] sm:$0xff]   ;;  %v1037_v57 = vld [vmem:[%s1319_s1 + $0x148] sm:$0xff]  }
  0x12   :  { %887 = vmatprep.subr.bf16.mxu1 %v1000_v17  ;;  %577 = vmatprep.mubr.bf16.mxu1 %v788_v37  ;;  %v1035_v55 = vld [vmem:[%s1319_s1 + $0x110] sm:$0xff]   ;;  %v1038_v59 = vld [vmem:[%s1319_s1 + $0x108] sm:$0xff]   ;;  %v1040_v62 = vld [vmem:[%s1319_s1 + $0x140] sm:$0xff]  }
  0x13   :  { %v1036_v56 = vld [vmem:[%s1319_s1 + $0x190] sm:$0xff]   ;;  %v1039_v61 = vld [vmem:[%s1319_s1 + $0x188] sm:$0xff]   ;;  %v1041_v63 = vld [vmem:[%s1319_s1 + $0x100] sm:$0xff]  }
  0x14   :  { %866 = vmatpush3.bf16.msra.mxu0 %v1001_v18  ;;  %v23_v58 = vld [vmem:[%s1320_s0 + $0x10] sm:$0xff]  ;;  %v1042_v0 = vld [vmem:[%s1319_s1 + $0x180] sm:$0xff]   ;;  %v1045_v2 = vld [vmem:[%s1320_s0 + $0x18] ss:$0 sps:$4 sm:$0xff]  }
  0x15   :  { %888 = vmatpush3.bf16.msra.mxu1 %v1002_v19  ;;  %867 = vmatprep.subr.bf16.mxu0 %v1003_v20  ;;  %v790_v60 = vcombine.high %v23_v58, %v23_v58  ;;  %v789_v1 = vcombine.low %v23_v58, %v23_v58  ;;  %v1046_v3 = vld [vmem:[%s1321_s3 + $0x38] sm:$0xff]   ;;  %v1047_v4 = vld [vmem:[%s1321_s3 + $0x30] sm:$0xff]   ;;  %v1048_v5 = vld [vmem:[%s1321_s3 + $0x28] sm:$0xff]  }
  0x16   :  { %889 = vmatprep.subr.bf16.mxu1 %v1004_v21  ;;  %v1049_v6 = vld [vmem:[%s1321_s3 + $0x20] sm:$0xff]   ;;  %v1050_v7 = vld [vmem:[%s1321_s3 + $0x18] sm:$0xff]   ;;  %v1051_v8 = vld [vmem:[%s1321_s3 + $0x10] sm:$0xff]  }
  0x17   :  { %v1052_v9 = vld [vmem:[%s1321_s3 + $0x8] sm:$0xff]   ;;  %v1053_v10 = vld [vmem:[%s1321_s3] sm:$0xff]  }
  0x18   :  { %868 = vmatpush3.bf16.msra.mxu0 %v1005_v22  ;;  %v784_v20 = vld [vmem:[%s1322_s2] ss:$0 sm:$0xff] }
  0x19   :  { %890 = vmatpush3.bf16.msra.mxu1 %v1006_v23  ;;  %869 = vmatprep.subr.bf16.mxu0 %v1007_v24  ;;  %v848_v37 = vld [vmem:[%s1323_s4] ss:$0 sm:$0xff] }
  0x1a   :  { %891 = vmatprep.subr.bf16.mxu1 %v1008_v25 }
  0x1c   :  { %870 = vmatpush3.bf16.msra.mxu0 %v1009_v26 }
  0x1d   :  { %892 = vmatpush3.bf16.msra.mxu1 %v1010_v27  ;;  %871 = vmatprep.subr.bf16.mxu0 %v1011_v28 }
  0x1e   :  { %893 = vmatprep.subr.bf16.mxu1 %v1012_v29 }
  0x20   :  { %872 = vmatpush3.bf16.msra.mxu0 %v1013_v30 }
  0x21   :  { %894 = vmatpush3.bf16.msra.mxu1 %v1014_v31  ;;  %901 = vmatprep.subr.bf16.mxu0 %v1019_v38 }
  0x22   :  { %941 = vmatprep.subr.bf16.mxu1 %v1054_v39 }
  0x23   :  { %538 = vmatmul.mubr.bf16.vlgmr.msra.gmra.mxu0 %v785_v34 }
  0x24   :  { %578 = vmatmul.mubr.bf16.vlgmr.msra.gmra.mxu1 %v787_v36  ;;  %902 = vmatpush3.bf16.msra.mxu0 %v1020_v40 }
  0x25   :  { %942 = vmatpush3.bf16.msra.mxu1 %v1021_v41  ;;  %903 = vmatprep.subr.bf16.mxu0 %v1022_v42 }
  0x26   :  { %943 = vmatprep.subr.bf16.mxu1 %v1054_v39  ;;  %957 = vmatprep.mubr.msk.bf16.mxu1 %vm1055_vm0, %v1054_v39 }
  0x27   :  { %617 = vmatprep.mubr.bf16.mxu0 %v790_v60 }
  0x28   :  { %904 = vmatpush3.bf16.msra.mxu0 %v1023_v43 }
  0x29   :  { %944 = vmatpush3.bf16.msra.mxu1 %v1024_v44  ;;  %905 = vmatprep.subr.bf16.mxu0 %v1025_v45 }
  0x2a   :  { %945 = vmatprep.subr.bf16.mxu1 %v1054_v39 }
  0x2c   :  { %906 = vmatpush3.bf16.msra.mxu0 %v1026_v46 }
  0x2d   :  { %946 = vmatpush3.bf16.msra.mxu1 %v1027_v47  ;;  %907 = vmatprep.subr.bf16.mxu0 %v1028_v48 }
  0x2e   :  { %947 = vmatprep.subr.bf16.mxu1 %v1054_v39 }
  0x30   :  { %908 = vmatpush3.bf16.msra.mxu0 %v1029_v49 }
  0x31   :  { %948 = vmatpush3.bf16.msra.mxu1 %v1030_v50  ;;  %909 = vmatprep.subr.bf16.mxu0 %v1031_v51 }
  0x32   :  { %949 = vmatprep.subr.bf16.mxu1 %v1054_v39 }
  0x34   :  { %910 = vmatpush3.bf16.msra.mxu0 %v1032_v52 }
  0x35   :  { %950 = vmatpush3.bf16.msra.mxu1 %v1033_v53  ;;  %911 = vmatprep.subr.bf16.mxu0 %v1034_v54 }
  0x36   :  { %951 = vmatprep.subr.bf16.mxu1 %v1054_v39 }
  0x38   :  { %912 = vmatpush3.bf16.msra.mxu0 %v1035_v55 }
  0x39   :  { %952 = vmatpush3.bf16.msra.mxu1 %v1036_v56  ;;  %913 = vmatprep.subr.bf16.mxu0 %v1037_v57 }
  0x3a   :  { %953 = vmatprep.subr.bf16.mxu1 %v1054_v39 }
  0x3c   :  { %914 = vmatpush3.bf16.msra.mxu0 %v1038_v59 }
  0x3d   :  { %954 = vmatpush3.bf16.msra.mxu1 %v1039_v61  ;;  %915 = vmatprep.subr.bf16.mxu0 %v1040_v62 }
  0x3e   :  { %955 = vmatprep.subr.bf16.mxu1 %v1054_v39 }
  0x40   :  { %916 = vmatpush3.bf16.msra.mxu0 %v1041_v63 }
  0x41   :  { %956 = vmatpush3.bf16.msra.mxu1 %v1042_v0  ;;  %961 = vmatprep.subr.bf16.mxu0 %v1054_v39 }
  0x43   :  { %618 = vmatmul.mubr.bf16.vlgmr.msra.gmra.mxu0 %v789_v1 }
  0x44   :  { %958 = vmatmul.mubr.bf16.vlgmr.msra.gmra.mxu1 %v1045_v2  ;;  %977 = vmatprep.mubr.msk.bf16.mxu0 %vm1055_vm0, %v1054_v39 }
  0x45   :  { %962 = vmatpush3.bf16.msra.mxu0 %v1046_v3 }
  0x46   :  { %963 = vmatprep.subr.bf16.mxu0 %v1054_v39 }
  0x49   :  { %964 = vmatpush3.bf16.msra.mxu0 %v1047_v4 }
  0x4a   :  { %965 = vmatprep.subr.bf16.mxu0 %v1054_v39 }
  0x4d   :  { %966 = vmatpush3.bf16.msra.mxu0 %v1048_v5 }
  0x4e   :  { %967 = vmatprep.subr.bf16.mxu0 %v1054_v39 }
  0x51   :  { %968 = vmatpush3.bf16.msra.mxu0 %v1049_v6 }
  0x52   :  { %969 = vmatprep.subr.bf16.mxu0 %v1054_v39 }
  0x55   :  { %970 = vmatpush3.bf16.msra.mxu0 %v1050_v7 }
  0x56   :  { %971 = vmatprep.subr.bf16.mxu0 %v1054_v39 }
  0x59   :  { %972 = vmatpush3.bf16.msra.mxu0 %v1051_v8 }
  0x5a   :  { %973 = vmatprep.subr.bf16.mxu0 %v1054_v39 }
  0x5d   :  { %974 = vmatpush3.bf16.msra.mxu0 %v1052_v9 }
  0x5e   :  { %975 = vmatprep.subr.bf16.mxu0 %v1054_v39 }
  0x61   :  { %976 = vmatpush3.bf16.msra.mxu0 %v1053_v10 }
  0xe3   :  { %v873_v11 = vpop.f32.mrf.mxu0 }
  0xe4   :  { %v895_v12 = vpop.f32.mrf.mxu1 }
  0xe5   :  { %v874_v13 = vpop.f32.mrf.mxu0 }
  0xe6   :  { %v896_v14 = vpop.f32.mrf.mxu1  ;;  %v875_v19 = vadd.f32 %v874_v13, %v873_v11 }
  0xe7   :  { %v876_v15 = vpop.f32.mrf.mxu0  ;;  %v897_v22 = vadd.f32 %v896_v14, %v895_v12 }
  0xe8   :  { %v898_v16 = vpop.f32.mrf.mxu1  ;;  %v540_v21 = vadd.f32 %v875_v19, %v784_v20 }
  0xe9   :  { %v877_v17 = vpop.f32.mrf.mxu0 }
  0xea   :  { %v899_v18 = vpop.f32.mrf.mxu1  ;;  %v580_v26 = vadd.f32 %v897_v22, %v540_v21 }
 0x103   :  { %v917_v23 = vpop.f32.mrf.mxu0 }
 0x104   :  { %v659_v24 = vpop.f32.mrf.mxu1 }
 0x105   :  { %v918_v25 = vpop.f32.mrf.mxu0 }
 0x106   :  { %v919_v27 = vadd.f32 %v918_v25, %v917_v23  ;;  %v959_v28 = vpop.f32.mrf.mxu1 }
 0x107   :  { %v920_v29 = vpop.f32.mrf.mxu0 }
 0x108   :  { %v620_v30 = vadd.f32 %v919_v27, %v580_v26  ;;  %v662_v31 = vpop.f32.mrf.mxu1 }
 0x109   :  { %v921_v32 = vpop.f32.mrf.mxu0 }
 0x10a   :  { %v660_v33 = vadd.f32 %v659_v24, %v620_v30  ;;  %v960_v34 = vpop.f32.mrf.mxu1 }
 0x10c   :  { %v665_v35 = vmax.f32 %v660_v33, 0.0 }
 0x10e   :  { %v666_v36 = vpack.c.bf16 %v665_v35, %v665_v35 }
 0x110   :  { %978 = vmatmul.mubr.bf16.vlgmr.msra.gmra.mxu0 %v666_v36 }
 0x1d0   :  { %v772_v38 = vpop.f32.mrf.mxu0 }
 0x1d1   :  { %v773_v39 = vadd.f32 %v848_v37, %v772_v38 }
 0x1d2   :  { %v979_v40 = vpop.f32.mrf.mxu0 }
 0x1d3   :  { %v778_v41 = vmax.f32 %v773_v39, 0.0 }
 0x1d4   :  { %v775_v42 = vpop.f32.mrf.mxu0 }
 0x1d5   :  { %779 = vst [vmem:[%s1324_s5] sm:$0xff] %v778_v41 }
 0x1d6   :  { %v980_v43 = vpop.f32.mrf.mxu0 }

</bundles_post_ra>
